<compile_context>
chip_gen: v6e
topology: v6e:2x2x1
jax: 0.10.0
libtpu: 0.0.40
codegen_flags: <defaults>
</compile_context>

<pallas_src>
import jax
import jax.numpy as jnp
from jax import lax
from jax.experimental import pallas as pl
from jax.experimental.pallas import tpu as pltpu


_LANE = 128
_SUBLANE = 8


def _pad_up(v: int, m: int) -> int:
    return -(-v // m) * m


# ---------------------------------------------------------------------------
# Row-major path: x is (N, C) exactly as the PyTorch module receives it.
# ---------------------------------------------------------------------------

def _rld_row_major_kernel(x_ref, y_ref, o_ref):
    """One (TN, C) row tile of the fused neighbor-difference + sign-flip.

    x_ref: (TN, C)    scores, VMEM
    y_ref: (1, TN)    int32 reference labels (lane-dense row), VMEM
    o_ref: (TN, C-1)  output, VMEM
    """
    x = x_ref[...]
    tn, c = x.shape

    # Lane-dense label row -> per-row column.  Lane->sublane move runs on the
    # XLU, which is idle in this purely memory-bound kernel.
    y_col = jnp.transpose(y_ref[...], (1, 0))          # (TN, 1) int32

    # Neighbor differences: Delta[i, j] = x[i, j] - x[i, j+1]
    # NOTE: the overlapping lane slice is fine for C <= 128 (typical ordinal
    # class counts).  For very wide heads, switch to pltpu.roll on a
    # 128-padded width to avoid cross-tile shuffle copies.
    seeleft = x[:, : c - 1] - x[:, 1:]                  # (TN, C-1)

    # j < rlabels[i] keeps the left difference, otherwise the negated (right) one.
    idx = lax.broadcasted_iota(jnp.int32, (tn, c - 1), 1)
    o_ref[...] = jnp.where(idx < y_col, seeleft, -seeleft).astype(o_ref.dtype)


# Per-call VMEM budget for the (double-buffered) row tile, using PHYSICAL bytes.
_ROW_VMEM_BUDGET = 8 * 1024 * 1024     # comfortably inside v7x's per-TC share
_MAX_ROW_TILE = 1024                   # streaming kernels hit ~85% HBM roofline ~512 rows
_VMEM_LIMIT_BYTES = 32 * 1024 * 1024   # explicit scoped-VMEM limit (safe on v5e/v6e/v7x)


def _phys_bytes_per_row(c: int, itemsize: int) -> int:
    # x row + out row are padded to full 128-lane tiles; the (1, TN) int32 label
    # block occupies 8 sublanes -> 32 B per row of the tile.
    return itemsize * (_pad_up(c, _LANE) + _pad_up(c - 1, _LANE)) + _SUBLANE * 4


def _pick_row_tile(n: int, c: int, itemsize: int) -> int:
    per_row = _phys_bytes_per_row(c, itemsize)
    tile = _ROW_VMEM_BUDGET // (2 * per_row)            # /2: Pallas double-buffers
    tile = min(tile, _MAX_ROW_TILE)
    tile = max(_LANE, (tile // _LANE) * _LANE)           # 128-multiple (label block lanes,
    if n <= tile:                                        #  bf16 16-row sublane packing)
        return n        # single block: "equals full dim" satisfies the (8,128) rule
    return tile


def right_and_left_delta(x: jax.Array, rlabels: jax.Array, *, row_tile: int | None = None) -> jax.Array:
    """JAX wrapper matching _RightAndLeftDelta.forward.

    x:       (N, C) float scores
    rlabels: (N,)   integer reference labels
    returns: (N, C-1), dtype = x.dtype
    """
    assert x.ndim == 2, x.ndim
    assert x.shape[1] > 1, x.shape[1]
    assert rlabels.ndim == 1, rlabels.ndim
    assert rlabels.shape[0] == x.shape[0]

    n, c = x.shape
    itemsize = x.dtype.itemsize
    y_row = rlabels.astype(jnp.int32).reshape(1, n)      # lane-dense label stream

    tn = _pick_row_tile(n, c, itemsize) if row_tile is None else row_tile
    grid = (pl.cdiv(n, tn),)

    cost = pl.CostEstimate(
        flops=2 * n * (c - 1),
        transcendentals=0,
        # Physical (lane-padded) bytes actually moved over HBM.
        bytes_accessed=n * itemsize * (_pad_up(c, _LANE) + _pad_up(c - 1, _LANE))
        + _SUBLANE * 4 * _pad_up(n, _LANE),
    )

    return pl.pallas_call(
        _rld_row_major_kernel,
        out_shape=jax.ShapeDtypeStruct((n, c - 1), x.dtype),
        grid=grid,
        in_specs=[
            pl.BlockSpec((tn, c), lambda i: (i, 0)),
            pl.BlockSpec((1, tn), lambda i: (0, i)),
        ],
        out_specs=pl.BlockSpec((tn, c - 1), lambda i: (i, 0)),
        compiler_params=pltpu.CompilerParams(
            # Row tiles are independent -> shard across both TCs on v7x megacore.
            dimension_semantics=("parallel",),
            vmem_limit_bytes=_VMEM_LIMIT_BYTES,
        ),
        cost_estimate=cost,
    )(x, y_row)


# ---------------------------------------------------------------------------
# Class-major path: for callers that can provide x as (C, N) (layout fused
# upstream).  All streams are lane-dense, ~10x less HBM traffic at C ~= 10.
# ---------------------------------------------------------------------------

def _rld_class_major_kernel(x_ref, y_ref, o_ref):
    """One (C, TL) lane tile of class-major scores.

    x_ref: (C, TL)    scores (class-major), VMEM
    y_ref: (1, TL)    int32 labels, VMEM (broadcasts over class rows directly)
    o_ref: (C-1, TL)  output (class-major), VMEM
    """
    x = x_ref[...]
    c, tl = x.shape
    y = y_ref[...]                                       # (1, TL)
    seeleft = x[: c - 1, :] - x[1:, :]                   # sublane shift (XLU)
    idx = lax.broadcasted_iota(jnp.int32, (c - 1, tl), 0)
    o_ref[...] = jnp.where(idx < y, seeleft, -seeleft).astype(o_ref.dtype)


_CM_VMEM_BUDGET = 8 * 1024 * 1024
_MAX_LANE_TILE = 4096


def _pick_lane_tile(n: int, c: int, itemsize: int) -> int:
    per_col = itemsize * (_pad_up(c, _SUBLANE) + _pad_up(c - 1, _SUBLANE)) + _SUBLANE * 4
    tile = _CM_VMEM_BUDGET // (2 * per_col)
    tile = min(tile, _MAX_LANE_TILE)
    tile = max(_LANE, (tile // _LANE) * _LANE)
    if n <= tile:
        return n
    return tile


def right_and_left_delta_class_major(x_t: jax.Array, rlabels: jax.Array, *, lane_tile: int | None = None) -> jax.Array:
    """Class-major variant: x_t is (C, N), returns (C-1, N)."""
    assert x_t.ndim == 2, x_t.ndim
    assert x_t.shape[0] > 1, x_t.shape[0]
    c, n = x_t.shape
    assert rlabels.shape == (n,)

    itemsize = x_t.dtype.itemsize
    y_row = rlabels.astype(jnp.int32).reshape(1, n)

    tl = _pick_lane_tile(n, c, itemsize) if lane_tile is None else lane_tile
    grid = (pl.cdiv(n, tl),)

    cost = pl.CostEstimate(
        flops=2 * n * (c - 1),
        transcendentals=0,
        bytes_accessed=_pad_up(n, _LANE) * (
            itemsize * (_pad_up(c, _SUBLANE) + _pad_up(c - 1, _SUBLANE)) + _SUBLANE * 4
        ),
    )

    return pl.pallas_call(
        _rld_class_major_kernel,
        out_shape=jax.ShapeDtypeStruct((c - 1, n), x_t.dtype),
        grid=grid,
        in_specs=[
            pl.BlockSpec((c, tl), lambda i: (0, i)),
            pl.BlockSpec((1, tl), lambda i: (0, i)),
        ],
        out_specs=pl.BlockSpec((c - 1, tl), lambda i: (0, i)),
        compiler_params=pltpu.CompilerParams(
            dimension_semantics=("parallel",),
            vmem_limit_bytes=_VMEM_LIMIT_BYTES,
        ),
        cost_estimate=cost,
    )(x_t, y_row)


# ---------------------------------------------------------------------------
# Pure-JAX reference + tests
# ---------------------------------------------------------------------------

def _reference(x, rlabels):
    seeleft = x[:, :-1] - x[:, 1:]
    idx = jnp.arange(seeleft.shape[1], dtype=jnp.int32)[None, :]
    return jnp.where(idx < rlabels.astype(jnp.int32)[:, None], seeleft, -seeleft)


if __name__ == "__main__":
    key = jax.random.PRNGKey(0)
    kx, ky = jax.random.split(key)

    # Small shape consistent with (nbr_samples, nbr_classes) ordinal scores.
    n, c = 8, 10
    x = jax.random.normal(kx, (n, c), dtype=jnp.float32)
    r = jax.random.randint(ky, (n,), 0, c, dtype=jnp.int32)
    out = jax.block_until_ready(right_and_left_delta(x, r))
    assert out.shape == (n, c - 1), out.shape
    assert jnp.allclose(out, _reference(x, r), atol=1e-6, rtol=1e-6), "mismatch (row-major)"

    # Multi-tile grid path: 3 row tiles of 128 (exercises the (1, 128) label block).
    n2 = 384
    x2 = jax.random.normal(kx, (n2, c), dtype=jnp.float32)
    r2 = jax.random.randint(ky, (n2,), 0, c, dtype=jnp.int32)
    out2 = jax.block_until_ready(right_and_left_delta(x2, r2, row_tile=128))
    assert jnp.allclose(out2, _reference(x2, r2), atol=1e-6, rtol=1e-6), "mismatch (tiled)"

    # Ragged last tile (masked writes on the final block).
    n3 = 200
    x3 = jax.random.normal(kx, (n3, c), dtype=jnp.float32)
    r3 = jax.random.randint(ky, (n3,), 0, c, dtype=jnp.int32)
    out3 = jax.block_until_ready(right_and_left_delta(x3, r3, row_tile=128))
    assert jnp.allclose(out3, _reference(x3, r3), atol=1e-6, rtol=1e-6), "mismatch (ragged)"

    # Class-major (lane-dense) variant for layout-fused callers.
    n4 = 256
    x4 = jax.random.normal(kx, (n4, c), dtype=jnp.float32)
    r4 = jax.random.randint(ky, (n4,), 0, c, dtype=jnp.int32)
    out4 = jax.block_until_ready(right_and_left_delta_class_major(x4.T, r4))
    assert out4.shape == (c - 1, n4), out4.shape
    assert jnp.allclose(out4.T, _reference(x4, r4), atol=1e-6, rtol=1e-6), "mismatch (class-major)"

    print("KERNEL_OK")
</pallas_src>

<mosaic_0001>
module attributes {stable_mosaic.version = 11 : i64} {
  func.func @_rld_row_major_kernel(%arg0: i32, %arg1: memref<8x10xf32, #tpu.memory_space<vmem>>, %arg2: memref<1x8xi32, #tpu.memory_space<vmem>>, %arg3: memref<8x9xf32, #tpu.memory_space<vmem>>) attributes {dimension_semantics = [#tpu.dimension_semantics<parallel>], iteration_bounds = array<i64: 1>, scalar_prefetch = 0 : i64, scratch_operands = 0 : i64, tpu.core_type = #tpu.core_type<tc>, window_params = [{transform_indices = @transform_0, window_bounds = array<i64: 8, 10>}, {transform_indices = @transform_1, window_bounds = array<i64: 1, 8>}, {transform_indices = @transform_2, window_bounds = array<i64: 8, 9>}]} {
    %c0 = arith.constant 0 : index
    %c0_0 = arith.constant 0 : index
    %0 = vector.load %arg1[%c0, %c0_0] : memref<8x10xf32, #tpu.memory_space<vmem>>, vector<8x10xf32>
    %c0_1 = arith.constant 0 : index
    %c0_2 = arith.constant 0 : index
    %1 = vector.load %arg2[%c0_1, %c0_2] : memref<1x8xi32, #tpu.memory_space<vmem>>, vector<1x8xi32>
    %2 = tpu.transpose %1, [1, 0] : vector<1x8xi32> -> vector<8x1xi32>
    %3 = vector.extract_strided_slice %0 {offsets = [0, 0], sizes = [8, 9], strides = [1, 1]} : vector<8x10xf32> to vector<8x9xf32>
    %4 = vector.extract_strided_slice %0 {offsets = [0, 1], sizes = [8, 9], strides = [1, 1]} : vector<8x10xf32> to vector<8x9xf32>
    %5 = arith.subf %3, %4 : vector<8x9xf32>
    %6 = tpu.iota {dimensions = array<i32: 1>} : vector<8x9xi32>
    %7 = vector.broadcast %2 : vector<8x1xi32> to vector<8x9xi32>
    %8 = arith.cmpi slt, %6, %7 : vector<8x9xi32>
    %cst = arith.constant 0.000000e+00 : f32
    %9 = vector.broadcast %cst : f32 to vector<8x9xf32>
    %10 = arith.subf %9, %5 : vector<8x9xf32>
    %11 = arith.select %8, %5, %10 : vector<8x9xi1>, vector<8x9xf32>
    %c0_3 = arith.constant 0 : index
    %c0_4 = arith.constant 0 : index
    %12 = vector.load %arg3[%c0_3, %c0_4] : memref<8x9xf32, #tpu.memory_space<vmem>>, vector<8x9xf32>
    tpu.vector_store %arg3[%c0_3, %c0_4], %11 {strides = array<i32>} : memref<8x9xf32, #tpu.memory_space<vmem>>, vector<8x9xf32>,
    return
  }
  func.func @transform_0(%arg0: i32) -> (i32, i32) {
    %c0_i32 = arith.constant 0 : i32
    %c0_i32_0 = arith.constant 0 : i32
    return %arg0, %c0_i32 : i32, i32
  }
  func.func @transform_1(%arg0: i32) -> (i32, i32) {
    %c0_i32 = arith.constant 0 : i32
    %c0_i32_0 = arith.constant 0 : i32
    return %c0_i32, %arg0 : i32, i32
  }
  func.func @transform_2(%arg0: i32) -> (i32, i32) {
    %c0_i32 = arith.constant 0 : i32
    %c0_i32_0 = arith.constant 0 : i32
    return %arg0, %c0_i32 : i32, i32
  }
}

</mosaic_0001>

<bundles_post_ra>
// kernel: tpu_custom_call.1
= control target key start
LH: loop header
LB: loop body
LE: loop exit
PB: predicated region body
PF: predicated region fallthrough
CT: control target
= control target key end

     0   :  { %7 = vsyncpa [#allocation3], 0  ;;  %s165_s0 = inlined_call_operand.hbm [shape: f32[8,10], index: 0, kind: input, shape index: {}]   ;;  %s166_s1 = inlined_call_operand.vmem [shape: s32[1,8], index: 1, kind: input, shape index: {}]   ;;  %s167_s2 = inlined_call_operand.hbm [shape: f32[8,9], index: 2, kind: output, shape index: {}]  }
   0x1   :  { %8 = vsyncpa [#allocation4], 0  ;;  %s137_s9 = smov [#allocation2]  }
   0x2   :  { %s15_s10 = sshll.u32 %s137_s9, 4  ;;  %s16_s10 = int_to_ptr.vmem [resolvable:$true] %s15_s10 }
   0x3   :  { %s101_s11 = scalar_lea.vmem %s16_s10, 128  ;;  %p106_p1 = scmp.lt.s32.totalorder %s16_s10, %s16_s10 }
   0x4   :  { %p102_p0 = scmp.ne.s32.totalorder %s16_s10, %s101_s11  ;;  %p107_p2 = scmp.lt.s32.totalorder %s101_s11, %s101_s11 }
   0x6   :  { %p108_p3 = por %p107_p2, %p106_p1 }
   0x8   :  { %p109_p4 = pnand %p108_p3, %p102_p0 }
   0xa   :  { %112 = shalt.err (!%p109_p4)
}
   0xb   :  { %18 = dma.hbm_to_vmem [thread:$0]  %s165_s0, 128, %s16_s10, [#allocation3]  }
   0xc   :  { %133 = dma.done.wait [#allocation3], 128  }
   0xd   :  { %134 = vsyncadd [#allocation3], 4294967168  ;;  %v25_v0 = vld [vmem:[%s166_s1] sm:$0x1]  ;;  %s138_s16 = smov 127   ;;  %v139_v2 = vmov 0   ;;  %v63_v5 = vlaneseq }
   0xe   :  { %v24_v1 = vld [vmem:[#allocation2] sm:$0xff]  ;;  %26 = vxpose.xlu0.b32.start.end [1/1] (short) (narrow) %v25_v0, 8  ;;  %s140_s0 = smov [#allocation5]   ;;  %vm71_vm0 = vcmask 72704  }
   0xf   :  { %59 = vrot.lane.b32.xlu1 %v24_v1, %s138_s16  ;;  %v64_v7 = vand.u32 127, %v63_v5  ;;  %s79_s17 = sshll.u32 %s140_s0, 4  ;;  %s80_s17 = int_to_ptr.vmem [resolvable:$true] %s79_s17 }
  0x10   :  { %s113_s1 = scalar_lea.vmem %s80_s17, 128  ;;  %p118_p6 = scmp.lt.s32.totalorder %s80_s17, %s80_s17 }
  0x11   :  { %p114_p5 = scmp.ne.s32.totalorder %s80_s17, %s113_s1  ;;  %p119_p7 = scmp.lt.s32.totalorder %s113_s1, %s113_s1 }
  0x13   :  { %p120_p8 = por %p119_p7, %p118_p6 }
  0x15   :  { %p121_p9 = pnand %p120_p8, %p114_p5 }
  0x37   :  { %92 = vset.pattern.permute.xlu0 %v139_v2 }
  0x81   :  { %v60_v4 = vpop.permute.xlu1 %59 }
  0x82   :  { %v62_v6 = vsub.f32 %v24_v1, %v60_v4 }
  0x84   :  { %v69_v8 = vsub.f32 0.0, %v62_v6 }
  0x8a   :  { %v42_v3 = vpop.trf.xlu0 }
  0x8b   :  { %66 = vperm.xlu0 %92, %v42_v3  }
 0x106   :  { %v67_v9 = vpop.permute.xlu0 %66 }
 0x107   :  { %vm68_vm1 = vcmp.lt.s32.totalorder %v64_v7, %v67_v9 }
 0x108   :  { %v70_v10 = vsel %vm68_vm1, %v62_v6, %v69_v8 }
 0x109   :  { %72 = vst.msk [vmem:[#allocation5] sm:$0xff] %vm71_vm0, %v70_v10 }
 0x10a   :  { %124 = shalt.err (!%p121_p9)
}
 0x10b   :  { %82 = dma.vmem_to_hbm [thread:$0]  %s80_s17, 128, %s167_s2, [#allocation4]  }
 0x10c   :  { %135 = dma.done.wait [#allocation4], 128  }
 0x10d   :  { %136 = vsyncadd [#allocation4], 4294967168 }
 0x10e   :  { %86 = vsyncpa [#allocation3], 1 }
 0x10f   :  { %87 = vsyncpa [#allocation4], 1 }

</bundles_post_ra>
